<compile_context>
chip_gen: v7x
topology: tpu7x:2x2x1
jax: 0.10.0
libtpu: 0.0.40
codegen_flags: <defaults>
</compile_context>

<pallas_src>
import functools

import jax
import jax.numpy as jnp
from jax.experimental import pallas as pl
from jax.experimental.pallas import tpu as pltpu

EPS = 1e-12  # F.normalize default eps


def _round_up(a, b):
    return (a + b - 1) // b * b


def _make_kernel(inv_temp):
    inv_temp = float(inv_temp)

    def kernel(x_ref, w_ref, o_ref):
        # x_ref: (tile_n, D) input dtype; w_ref: (D, C_pad) bf16;
        # o_ref: (tile_n, C_pad) f32.
        x = x_ref[...].astype(jnp.float32)

        # Fused L2-normalize + 1/temp as a single per-row scale (f32 math).
        # rsqrt(max(sumsq, eps^2)) == 1 / max(||x||, eps)  (F.normalize clamp).
        sumsq = jnp.sum(x * x, axis=-1, keepdims=True)
        scale = jax.lax.rsqrt(jnp.maximum(sumsq, EPS * EPS)) * inv_temp

        # bf16 operands, f32 accumulate on the MXU; contract x's last dim with
        # w's leading dim (natural (M,K)x(K,N) layout, no in-kernel transpose).
        out = jax.lax.dot_general(
            x.astype(jnp.bfloat16),
            w_ref[...],
            dimension_numbers=(((1,), (0,)), ((), ())),
            preferred_element_type=jnp.float32,
        )

        # Per-row scale applied AFTER the matmul: a (tile_n, C_pad) VPU pass
        # instead of a (tile_n, D) one.
        o_ref[...] = (out * scale).astype(o_ref.dtype)

    return kernel


@functools.partial(jax.jit, static_argnames=("temp", "tile_n"))
def resclassifier_mme_forward(x, weight, temp=0.05, tile_n=512):
    """x: (N, D), weight: (C, D)  ->  logits (N, C) float32."""
    N, D = x.shape
    C, D_w = weight.shape
    assert D == D_w, (D, D_w)

    # Lane-dense output: pad the class dim up to a multiple of 128.
    C_pad = max(128, _round_up(C, 128))

    # One-time weight prep (tiny vs. the per-step x traffic):
    # transpose to (D, C), zero-pad classes to C_pad, cast to bf16.
    w_pad = weight.T
    if C_pad != C:
        w_pad = jnp.pad(w_pad, ((0, 0), (0, C_pad - C)))
    w_pad = w_pad.astype(jnp.bfloat16)

    # ---- Row-tile selection -------------------------------------------------
    tile_n = int(tile_n)
    # v7x megacore: make sure the "parallel" grid has >= 2 steps when possible.
    if N >= 16:
        tile_n = min(tile_n, _round_up(pl.cdiv(N, 2), 8))
    tile_n = max(8, _round_up(min(tile_n, _round_up(N, 8)), 8))

    x_bytes = jnp.dtype(x.dtype).itemsize
    w_bytes = jnp.dtype(w_pad.dtype).itemsize

    def vmem_need(tn):
        # x: double-buffered tiles; weight: 2 buffers allocated (constant index
        # map -> DMA'd only once); out: double-buffered f32 tiles.
        return (2 * tn * D * x_bytes
                + 2 * D * C_pad * w_bytes
                + 2 * tn * C_pad * 4)

    # Keep the footprint comfortably inside every generation's VMEM.
    while tile_n > 64 and vmem_need(tile_n) > 48 * 1024 * 1024:
        tile_n = max(64, _round_up(tile_n // 2, 8))

    if tile_n >= N:
        tile_n = N  # one block == whole batch (valid even if N % 8 != 0)

    grid = (pl.cdiv(N, tile_n),)

    vmem_limit = int(min(64 * 1024 * 1024,
                         max(16 * 1024 * 1024,
                             vmem_need(tile_n) * 5 // 4 + (1 << 20))))

    cost = pl.CostEstimate(
        flops=2 * N * D * C_pad,
        transcendentals=N,
        bytes_accessed=x_bytes * N * D + w_bytes * D * C_pad + 4 * N * C_pad,
    )

    out = pl.pallas_call(
        _make_kernel(1.0 / temp),
        out_shape=jax.ShapeDtypeStruct((N, C_pad), jnp.float32),
        grid_spec=pltpu.PrefetchScalarGridSpec(
            num_scalar_prefetch=0,
            grid=grid,
            in_specs=[
                pl.BlockSpec((tile_n, D), lambda i: (i, 0)),   # x tile (pipelined)
                pl.BlockSpec((D, C_pad), lambda i: (0, 0)),    # weight (resident)
            ],
            out_specs=pl.BlockSpec((tile_n, C_pad), lambda i: (i, 0)),
        ),
        compiler_params=pltpu.CompilerParams(
            dimension_semantics=("parallel",),
            vmem_limit_bytes=vmem_limit,
        ),
        cost_estimate=cost,
    )(x, w_pad)

    # TODO(synk): single-buffer the loop-invariant weight / deepen x buffering
    # via BlockSpec pipeline_mode once exercised on-target; with C_pad=128 the
    # duplicate weight buffer is < 0.5*D KiB, so it is not the tiling blocker.
    return out if C == C_pad else out[:, :C]


if __name__ == "__main__":
    # Small shapes consistent with the module: (batch, input_size) -> (batch, num_classes)
    batch = 8
    input_size = 128
    num_classes = 12
    temp = 0.05

    key = jax.random.PRNGKey(0)
    kx, kw = jax.random.split(key)
    x = jax.random.normal(kx, (batch, input_size), dtype=jnp.float32)
    # weights_init: normal(0.0, 0.1), deterministic in-script.
    weight = 0.1 * jax.random.normal(kw, (num_classes, input_size), dtype=jnp.float32)

    out = resclassifier_mme_forward(x, weight, temp=temp)
    out = jax.block_until_ready(out)

    # Pure-JAX reference (PyTorch F.normalize + Linear(bias=False) / temp).
    xn = x / jnp.maximum(jnp.linalg.norm(x, axis=1, keepdims=True), EPS)
    ref = (xn @ weight.T) / temp
    assert out.shape == (batch, num_classes)
    # bf16 MXU operands (f32 accumulate) -> looser tolerance than pure f32.
    assert jnp.allclose(out, ref, atol=5e-2, rtol=5e-2), "mismatch vs reference"

    print("KERNEL_OK")
</pallas_src>

<mosaic_0001>
module attributes {stable_mosaic.version = 11 : i64} {
  func.func @kernel(%arg0: i32, %arg1: memref<8x128xf32, #tpu.memory_space<vmem>>, %arg2: memref<128x128xbf16, #tpu.memory_space<vmem>>, %arg3: memref<8x128xf32, #tpu.memory_space<vmem>>) attributes {dimension_semantics = [#tpu.dimension_semantics<parallel>], iteration_bounds = array<i64: 1>, scalar_prefetch = 0 : i64, scratch_operands = 0 : i64, tpu.core_type = #tpu.core_type<tc>, window_params = [{transform_indices = @transform_0, window_bounds = array<i64: 8, 128>}, {pipeline_mode = #tpu.pipeline_mode<synchronous>, transform_indices = @transform_1, window_bounds = array<i64: 128, 128>}, {transform_indices = @transform_2, window_bounds = array<i64: 8, 128>}]} {
    %c0 = arith.constant 0 : index
    %c0_0 = arith.constant 0 : index
    %0 = vector.load %arg1[%c0, %c0_0] : memref<8x128xf32, #tpu.memory_space<vmem>>, vector<8x128xf32>
    %1 = arith.mulf %0, %0 : vector<8x128xf32>
    %cst = arith.constant dense<0.000000e+00> : vector<8xf32>
    %2 = vector.multi_reduction <add>, %1, %cst [1] : vector<8x128xf32> to vector<8xf32>
    %3 = vector.shape_cast %2 : vector<8xf32> to vector<8x1xf32>
    %cst_1 = arith.constant 1.000000e-24 : f32
    %4 = vector.broadcast %cst_1 : f32 to vector<8x1xf32>
    %5 = arith.maximumf %3, %4 : vector<8x1xf32>
    %6 = math.rsqrt %5 : vector<8x1xf32>
    %cst_2 = arith.constant 2.000000e+01 : f32
    %7 = vector.broadcast %cst_2 : f32 to vector<8x1xf32>
    %8 = arith.mulf %6, %7 : vector<8x1xf32>
    %9 = arith.truncf %0 : vector<8x128xf32> to vector<8x128xbf16>
    %c0_3 = arith.constant 0 : index
    %c0_4 = arith.constant 0 : index
    %10 = vector.load %arg2[%c0_3, %c0_4] : memref<128x128xbf16, #tpu.memory_space<vmem>>, vector<128x128xbf16>
    %cst_5 = arith.constant dense<0.000000e+00> : vector<8x128xf32>
    %11 = tpu.matmul %9, %10, %cst_5 {dimension_numbers = #tpu.dot_dimension_numbers<[1], [0], [0], [1], [0, 0, 1, 1], [], []>} : vector<8x128xbf16>, vector<128x128xbf16>, vector<8x128xf32> -> vector<8x128xf32>
    %12 = vector.broadcast %8 : vector<8x1xf32> to vector<8x128xf32>
    %13 = arith.mulf %11, %12 : vector<8x128xf32>
    %c0_6 = arith.constant 0 : index
    %c0_7 = arith.constant 0 : index
    %14 = vector.load %arg3[%c0_6, %c0_7] : memref<8x128xf32, #tpu.memory_space<vmem>>, vector<8x128xf32>
    tpu.vector_store %arg3[%c0_6, %c0_7], %13 {strides = array<i32>} : memref<8x128xf32, #tpu.memory_space<vmem>>, vector<8x128xf32>,
    return
  }
  func.func @transform_0(%arg0: i32) -> (i32, i32) {
    %c0_i32 = arith.constant 0 : i32
    %c0_i32_0 = arith.constant 0 : i32
    return %arg0, %c0_i32 : i32, i32
  }
  func.func @transform_1(%arg0: i32) -> (i32, i32) {
    %c0_i32 = arith.constant 0 : i32
    %c0_i32_0 = arith.constant 0 : i32
    %c0_i32_1 = arith.constant 0 : i32
    return %c0_i32, %c0_i32_0 : i32, i32
  }
  func.func @transform_2(%arg0: i32) -> (i32, i32) {
    %c0_i32 = arith.constant 0 : i32
    %c0_i32_0 = arith.constant 0 : i32
    return %arg0, %c0_i32 : i32, i32
  }
}

</mosaic_0001>

<bundles_post_ra>
// kernel: resclassifier_mme_forward.1
= control target key start
LH: loop header
LB: loop body
LE: loop exit
PB: predicated region body
PF: predicated region fallthrough
CT: control target
= control target key end

     0   :  { %v215_v1 = vmov 0.0   ;;  %vm216_vm0 = vmmov 0   ;;  %s272_s0 = inlined_call_operand.vmem [shape: f32[8,128], index: 0, kind: input, shape index: {}]   ;;  %s273_s1 = inlined_call_operand.vmem [shape: bf16[128,128], index: 1, kind: input, shape index: {}]   ;;  %s274_s2 = inlined_call_operand.hbm [shape: f32[8,128], index: 2, kind: output, shape index: {}]  }
   0x1   :  { %v181_v0 = vld [vmem:[%s273_s1] sm:$0xff]   ;;  %158 = vmatprep.subr.bf16.mxu0 %v215_v1  ;;  %v182_v2 = vld [vmem:[%s273_s1 + $0x8] sm:$0xff]   ;;  %174 = vmatprep.mubr.msk.bf16.mxu0 %vm216_vm0, %v215_v1  ;;  %v183_v3 = vld [vmem:[%s273_s1 + $0x10] sm:$0xff]  }
   0x2   :  { %159 = vmatpush3.bf16.msra.mxu0 %v181_v0  ;;  %v13_v4 = vld [vmem:[%s272_s0] sm:$0xff] }
   0x3   :  { %160 = vmatprep.subr.bf16.mxu0 %v215_v1 }
   0x6   :  { %161 = vmatpush3.bf16.msra.mxu0 %v182_v2 }
   0x7   :  { %162 = vmatprep.subr.bf16.mxu0 %v215_v1 }
   0x8   :  { %7 = vsyncpa [#allocation3], 0  ;;  %v14_v5 = vmul.f32 %v13_v4, %v13_v4  ;;  %v184_v6 = vld [vmem:[%s273_s1 + $0x18] sm:$0xff]   ;;  %v185_v7 = vld [vmem:[%s273_s1 + $0x20] sm:$0xff]   ;;  %v20_v11 = vpack.c.bf16 %v13_v4, %v13_v4  ;;  %s217_s26 = smov [#allocation2]  }
   0x9   :  { %v186_v8 = vld [vmem:[%s273_s1 + $0x28] sm:$0xff]   ;;  %v187_v9 = vld [vmem:[%s273_s1 + $0x30] sm:$0xff]   ;;  %v188_v10 = vld [vmem:[%s273_s1 + $0x38] sm:$0xff]   ;;  %s133_s27 = sshll.u32 %s217_s26, 4  ;;  %s134_s27 = int_to_ptr.vmem [resolvable:$true] %s133_s27 }
   0xa   :  { %163 = vmatpush3.bf16.msra.mxu0 %v183_v3  ;;  %15 = vadd.xlane.f32.xlu0 %v14_v5  ;;  %s191_s28 = scalar_lea.vmem %s134_s27, 128  ;;  %p196_p1 = scmp.lt.s32.totalorder %s134_s27, %s134_s27 }
   0xb   :  { %164 = vmatprep.subr.bf16.mxu0 %v215_v1  ;;  %p192_p0 = scmp.ne.s32.totalorder %s134_s27, %s191_s28  ;;  %p197_p2 = scmp.lt.s32.totalorder %s191_s28, %s191_s28 }
   0xd   :  { %p198_p3 = por %p197_p2, %p196_p1 }
   0xe   :  { %165 = vmatpush3.bf16.msra.mxu0 %v184_v6 }
   0xf   :  { %166 = vmatprep.subr.bf16.mxu0 %v215_v1  ;;  %p199_p4 = pnand %p198_p3, %p192_p0 }
  0x12   :  { %167 = vmatpush3.bf16.msra.mxu0 %v185_v7 }
  0x13   :  { %168 = vmatprep.subr.bf16.mxu0 %v215_v1 }
  0x16   :  { %169 = vmatpush3.bf16.msra.mxu0 %v186_v8 }
  0x17   :  { %170 = vmatprep.subr.bf16.mxu0 %v215_v1 }
  0x1a   :  { %171 = vmatpush3.bf16.msra.mxu0 %v187_v9 }
  0x1b   :  { %172 = vmatprep.subr.bf16.mxu0 %v215_v1 }
  0x1e   :  { %173 = vmatpush3.bf16.msra.mxu0 %v188_v10 }
  0x21   :  { %175 = vmatmul.mubr.bf16.vlgmr.msra.gmra.mrb[0].mxu0 %v20_v11 }
  0x97   :  { %v16_v12 = vpop.xlane.xlu0 %15 }
  0x98   :  { %v17_v13 = vmax.f32 %v16_v12, 1e-24 }
  0x9a   :  { %189 = vrsqrt.f32 %v17_v13 }
  0xa4   :  { %v190_v14 = vpop.eup %189 }
  0xa5   :  { %v19_v15 = vmul.f32 20.0, %v190_v14 }
  0xf4   :  { %v119_v16 = vpop.f32.mrb[0].mxu0 }
  0xf5   :  { %v125_v17 = vmul.f32 %v119_v16, %v19_v15  ;;  %v176_v18 = vpop.f32.mrb[1].mxu0 }
  0xf6   :  { %v122_v19 = vpop.f32.mrb[2].mxu0 }
  0xf7   :  { %126 = vst [vmem:[#allocation2] sm:$0xff] %v125_v17  ;;  %v177_v20 = vpop.f32.mrb[3].mxu0 }
  0xf8   :  { %202 = shalt.err (!%p199_p4)
}
  0xf9   :  { %s203_s30 = scalar_lea.hbm %s274_s2, 128 }
  0xfa   :  { %p204_p5 = scmp.ne.s32.totalorder %s274_s2, %s203_s30  ;;  %p207_p6 = scmp.lt.u32.totalorder %s203_s30, %s274_s2 }
  0xfc   :  { %p209_p7 = pnand %p207_p6, %p204_p5 }
  0xfe   :  { %212 = shalt.err (!%p209_p7)
}
  0xff   :  { %136 = dma.vmem_to_hbm [thread:$0]  %s134_s27, 128, %s274_s2, [#allocation3]  }
 0x100   :  { %213 = dma.done.wait [#allocation3], 128  }
 0x101   :  { %214 = vsyncadd [#allocation3], 4294967168 }
 0x102   :  { %140 = vsyncpa [#allocation3], 1 }

</bundles_post_ra>
